<compile_context>
chip_gen: v7x
topology: tpu7x:2x2x1
jax: 0.10.0
libtpu: 0.0.40
codegen_flags: <defaults>
</compile_context>

<pallas_src>
import functools

import jax
import jax.numpy as jnp
from jax.experimental import pallas as pl
from jax.experimental.pallas import tpu as pltpu

LEAKY_RATE = 0.1


def _make_key(dist, tie_bits):
  """Sortable int32 key: distance bits with the column index in the low bits."""
  t, n = dist.shape
  dist = jnp.maximum(dist, 0.0)                 # kill tiny negative cancellation
  col = jax.lax.broadcasted_iota(jnp.int32, (t, n), 1)
  key = pltpu.bitcast(dist, jnp.int32)          # non-neg f32 -> order-preserving int
  key = jnp.bitwise_or(
      jnp.bitwise_and(key, jnp.int32(~((1 << tie_bits) - 1))), col)
  return key


def _stage1_kernel(q1_ref, k2_ref, proj2_ref, base1_ref,
                   w1_ref, b1_ref, ww1_ref, wb1_ref, ww2_ref, wb2_ref,
                   p2p_ref, *, nsample, tie_bits):
  q1 = q1_ref[0]            # (T, 5)        f32   [-2*x1 | 1 | ||x1||^2]
  k2 = k2_ref[0]            # (5, N2)       f32   [x2 ; ||x2||^2 ; 1]
  proj2 = proj2_ref[0]      # (N2, H0+WH0)  bf16  pre-projected gather operand
  base1 = base1_ref[0]      # (T, H0+WH0)   f32   k-invariant additive terms
  w1 = w1_ref[...]          # (H0, H1) bf16
  b1 = b1_ref[...]          # (1, H1)  f32
  ww1 = ww1_ref[...]
  wb1 = wb1_ref[...]
  ww2 = ww2_ref[...]
  wb2 = wb2_ref[...]
  h0 = w1.shape[0]
  c_last = ww2.shape[1]
  t = q1.shape[0]

  def leaky(v):
    return jnp.maximum(v, LEAKY_RATE * v)

  def relu(v):
    return jnp.maximum(v, 0.0)

  def mmb(a, b):
    return jnp.dot(a.astype(jnp.bfloat16), b, preferred_element_type=jnp.float32)

  # squared distances on the MXU (kept f32 so neighbour ranking is exact-ish).
  dist = jnp.dot(q1, k2, preferred_element_type=jnp.float32,
                 precision=jax.lax.Precision.HIGHEST)
  key0 = _make_key(dist, tie_bits)
  int_max = jnp.int32(jnp.iinfo(jnp.int32).max)

  def body(_, carry):
    key, acc = carry
    m = jnp.min(key, axis=-1, keepdims=True)           # one XLU reduction per k
    onehot = key == m                                   # unique by construction
    key = jnp.where(onehot, int_max, key)
    oh = jnp.where(onehot, 1.0, 0.0).astype(jnp.bfloat16)
    # fused gather: one (T, N2) @ (N2, H0+WH0) matmul feeds both the conv-MLP
    # layer 0 and WeightNet1 layer 0 for this neighbour.
    h_all = jnp.dot(oh, proj2, preferred_element_type=jnp.float32) + base1
    conv_h = leaky(h_all[:, :h0])                       # conv0 (leaky relu)
    wn_h = relu(h_all[:, h0:])                          # weightnet1 layer 0
    conv_h = leaky(mmb(conv_h, w1) + b1)                # conv1
    wn_h = relu(mmb(wn_h, ww1) + wb1)                   # weightnet1 layer 1
    wn_h = relu(mmb(wn_h, ww2) + wb2)                   # weightnet1 layer 2
    return key, acc + wn_h * conv_h                     # sum over K

  acc0 = jnp.zeros((t, c_last), jnp.float32)
  _, acc = jax.lax.fori_loop(0, nsample, body, (key0, acc0),
                             unroll=nsample <= 8)
  p2p_ref[0] = acc


def _stage2_kernel(q1_ref, k1_ref, slab_ref, base2_ref,
                   ww1_ref, wb1_ref, ww2_ref, wb2_ref,
                   out_ref, *, nsample, tie_bits):
  q1 = q1_ref[0]            # (T, 5)            f32
  k1 = k1_ref[0]            # (5, N1)           f32
  slab = slab_ref[0]        # (N1, C + WH0)     bf16  [p2p | x1 @ wn2_w0]
  base2 = base2_ref[0]      # (T, WH0)          f32   wn2_b0 - x1_tile @ wn2_w0
  ww1 = ww1_ref[...]
  wb1 = wb1_ref[...]
  ww2 = ww2_ref[...]
  wb2 = wb2_ref[...]
  c_last = ww2.shape[1]
  t = q1.shape[0]

  def relu(v):
    return jnp.maximum(v, 0.0)

  def mmb(a, b):
    return jnp.dot(a.astype(jnp.bfloat16), b, preferred_element_type=jnp.float32)

  dist = jnp.dot(q1, k1, preferred_element_type=jnp.float32,
                 precision=jax.lax.Precision.HIGHEST)
  key0 = _make_key(dist, tie_bits)
  int_max = jnp.int32(jnp.iinfo(jnp.int32).max)

  def body(_, carry):
    key, acc = carry
    m = jnp.min(key, axis=-1, keepdims=True)
    onehot = key == m
    key = jnp.where(onehot, int_max, key)
    oh = jnp.where(onehot, 1.0, 0.0).astype(jnp.bfloat16)
    gath = jnp.dot(oh, slab, preferred_element_type=jnp.float32)  # (T, C+WH0)
    gcost = gath[:, :c_last]                    # gathered point-to-patch cost
    wn_h = relu(gath[:, c_last:] + base2)       # weightnet2 layer 0
    wn_h = relu(mmb(wn_h, ww1) + wb1)           # weightnet2 layer 1
    wn_h = relu(mmb(wn_h, ww2) + wb2)           # weightnet2 layer 2
    return key, acc + wn_h * gcost

  acc0 = jnp.zeros((t, c_last), jnp.float32)
  _, acc = jax.lax.fori_loop(0, nsample, body, (key0, acc0),
                             unroll=nsample <= 8)

  # Lane-dense store: emit (c_last, T) via an exact identity-matmul transpose,
  # so the final output is [B, c_last, N1] with no masked-lane epilogue and no
  # wrapper transpose.
  eye = (jax.lax.broadcasted_iota(jnp.int32, (c_last, c_last), 0) ==
         jax.lax.broadcasted_iota(jnp.int32, (c_last, c_last), 1)
         ).astype(jnp.float32)
  out_ref[0] = jax.lax.dot_general(
      eye, acc, (((1,), (1,)), ((), ())),
      precision=jax.lax.Precision.HIGHEST,
      preferred_element_type=jnp.float32)


def _pick_tile(n, cap):
  """Largest tile <= cap that keeps every BlockSpec legal (128-multiple or full)."""
  if n <= cap:
    return n
  for t in range(cap - cap % 128, 0, -128):
    if n % t == 0:
      return t
  return n


def pointconv_flow(xyz1, xyz2, points1, points2, params, nsample, tile_cap=256):
  """xyz*: [B,3,N], points*: [B,D,N]  ->  [B, mlp[-1], N1] (PyTorch layout).

  tile_cap=256 is sized for v7x (64 MiB VMEM, 32 MiB scoped default) with
  N up to ~8K; on v5e/v6e it can be raised to 512-1024 (optionally together
  with pltpu.CompilerParams(vmem_limit_bytes=...)).
  """
  B, _, N1 = xyz1.shape
  N2 = xyz2.shape[2]
  D1 = points1.shape[1]
  D2 = points2.shape[1]
  f32, bf16 = jnp.float32, jnp.bfloat16
  assert nsample <= min(N1, N2), "nsample must not exceed the point counts"

  x1 = jnp.transpose(xyz1, (0, 2, 1)).astype(f32)   # (B, N1, 3)
  x2 = jnp.transpose(xyz2, (0, 2, 1)).astype(f32)   # (B, N2, 3)
  p1 = jnp.transpose(points1, (0, 2, 1)).astype(f32)
  p2 = jnp.transpose(points2, (0, 2, 1)).astype(f32)

  w0, b0 = params["w0"], params["b0"]              # (D1+D2+3, H0), (1, H0)
  w1, b1 = params["w1"], params["b1"]              # (H0, H1), (1, H1)
  w0a, w0b, w0c = w0[:D1], w0[D1:D1 + D2], w0[D1 + D2:]
  (wn1_w0, wn1_b0), (wn1_w1, wn1_b1), (wn1_w2, wn1_b2) = params["wn1"]
  (wn2_w0, wn2_b0), (wn2_w1, wn2_b1), (wn2_w2, wn2_b2) = params["wn2"]
  h0 = w0.shape[1]
  wh1 = wn1_w0.shape[1]
  wh2 = wn2_w0.shape[1]
  c_last = wn1_w2.shape[1]
  assert w1.shape[1] == c_last  # module invariant: WeightNet out == mlp[-1]

  # ---- k-invariant precomputation (cheap XLA, keeps the kernels lean) -------
  ones1 = jnp.ones((B, N1, 1), f32)
  ones2 = jnp.ones((B, N2, 1), f32)
  x1sq = jnp.sum(x1 * x1, -1, keepdims=True)
  x2sq = jnp.sum(x2 * x2, -1, keepdims=True)
  q1 = jnp.concatenate([-2.0 * x1, ones1, x1sq], -1)                      # (B,N1,5)
  k2 = jnp.transpose(jnp.concatenate([x2, x2sq, ones2], -1), (0, 2, 1))   # (B,5,N2)
  k1 = jnp.transpose(jnp.concatenate([x1, x1sq, ones1], -1), (0, 2, 1))   # (B,5,N1)

  # Fused gather operand for stage 1:  [p2 | x2] @ [[w0b, 0], [w0c, wn1_w0]].
  proj2 = jnp.concatenate([p2 @ w0b + x2 @ w0c, x2 @ wn1_w0], -1).astype(bf16)
  # Per-query k-invariant additive terms: [conv0 base | weightnet1-layer0 base].
  base1 = jnp.concatenate([p1 @ w0a + b0 - x1 @ w0c,
                           wn1_b0 - x1 @ wn1_w0], -1)

  tile = _pick_tile(N1, tile_cap)
  assert N1 % tile == 0
  grid = (B, N1 // tile)
  bits1 = max((N1 - 1).bit_length(), 1)
  bits2 = max((N2 - 1).bit_length(), 1)

  def tiled(tail):
    return pl.BlockSpec((1, tile) + tail,
                        lambda b, t: (b, t) + (0,) * len(tail))

  def per_batch(tail):
    return pl.BlockSpec((1,) + tail,
                        lambda b, t: (b,) + (0,) * len(tail))

  def full2d(arr):
    return pl.BlockSpec(arr.shape, lambda b, t: (0, 0))

  cparams = pltpu.CompilerParams(dimension_semantics=("parallel", "parallel"))

  # ---------------- stage 1: point-to-patch cost (xyz1 -> xyz2) --------------
  small1 = [w1.astype(bf16), b1, wn1_w1.astype(bf16), wn1_b1,
            wn1_w2.astype(bf16), wn1_b2]
  p2p = pl.pallas_call(
      functools.partial(_stage1_kernel, nsample=nsample, tie_bits=bits2),
      out_shape=jax.ShapeDtypeStruct((B, N1, c_last), f32),
      grid=grid,
      in_specs=[tiled((5,)), per_batch((5, N2)), per_batch((N2, h0 + wh1)),
                tiled((h0 + wh1,))] + [full2d(a) for a in small1],
      out_specs=pl.BlockSpec((1, tile, c_last), lambda b, t: (b, t, 0)),
      compiler_params=cparams,
  )(q1, k2, proj2, base1, *small1)

  # ---------------- stage 2: patch-to-patch cost (xyz1 -> xyz1) --------------
  x1wn2 = x1 @ wn2_w0                                     # (B, N1, WH0)
  slab2 = jnp.concatenate([p2p, x1wn2], -1).astype(bf16)  # (B, N1, C+WH0)
  base2 = wn2_b0 - x1wn2                                  # (B, N1, WH0)
  small2 = [wn2_w1.astype(bf16), wn2_b1, wn2_w2.astype(bf16), wn2_b2]

  out = pl.pallas_call(
      functools.partial(_stage2_kernel, nsample=nsample, tie_bits=bits1),
      out_shape=jax.ShapeDtypeStruct((B, c_last, N1), f32),
      grid=grid,
      in_specs=[tiled((5,)), per_batch((5, N1)),
                per_batch((N1, c_last + wh2)), tiled((wh2,))]
               + [full2d(a) for a in small2],
      out_specs=pl.BlockSpec((1, c_last, tile), lambda b, t: (b, 0, t)),
      compiler_params=cparams,
  )(q1, k1, slab2, base2, *small2)

  return out  # [B, c_last, N1] -- already channel-first, no transpose needed


def init_params(key, D1, D2, mlp, weight_hidden=(8, 8)):
  """Deterministic synthetic parameters. Weights stored as (fan_in, fan_out)."""
  assert len(mlp) == 2, "kernel is written for the 2-layer mlp used here"
  in_ch = D1 + D2 + 3
  last = mlp[-1]
  keys = iter(jax.random.split(key, 16))

  def lin(k, fan_in, fan_out, scale=0.3):
    kw, kb = jax.random.split(k)
    w = jax.random.normal(kw, (fan_in, fan_out), jnp.float32) * scale
    b = jax.random.normal(kb, (1, fan_out), jnp.float32) * scale
    return w, b

  w0, b0 = lin(next(keys), in_ch, mlp[0])
  w1, b1 = lin(next(keys), mlp[0], mlp[1])

  def wn_params():
    dims = (3,) + tuple(weight_hidden) + (last,)
    return [lin(next(keys), dims[i], dims[i + 1]) for i in range(len(dims) - 1)]

  return dict(w0=w0, b0=b0, w1=w1, b1=b1, wn1=wn_params(), wn2=wn_params())


def reference_forward(xyz1, xyz2, points1, points2, params, nsample):
  """Pure-JAX mirror of the PyTorch forward (correctness check only)."""
  x1 = jnp.transpose(xyz1, (0, 2, 1))
  x2 = jnp.transpose(xyz2, (0, 2, 1))
  p1 = jnp.transpose(points1, (0, 2, 1))
  p2 = jnp.transpose(points2, (0, 2, 1))
  B, N1, _ = x1.shape

  def sqdist(a, b):
    diff = a[:, :, None, :] - b[:, None, :, :]
    return jnp.sum(diff * diff, axis=-1)

  gather = jax.vmap(lambda pts, idx: pts[idx])
  leaky = lambda v: jnp.maximum(v, LEAKY_RATE * v)
  relu = lambda v: jnp.maximum(v, 0.0)

  def wn(direction, layers):
    h = direction
    for (w, b) in layers:
      h = relu(h @ w + b[0])
    return h

  idx = jnp.argsort(sqdist(x1, x2), axis=-1)[..., :nsample]
  nb = gather(x2, idx)
  direction = nb - x1[:, :, None, :]
  gp2 = gather(p2, idx)
  gp1 = jnp.broadcast_to(p1[:, :, None, :], (B, N1, nsample, p1.shape[-1]))
  feat = jnp.concatenate([gp1, gp2, direction], axis=-1)
  h = leaky(feat @ params["w0"] + params["b0"][0])
  h = leaky(h @ params["w1"] + params["b1"][0])
  w = wn(direction, params["wn1"])
  p2p = jnp.sum(w * h, axis=2)                       # [B, N1, c_last]

  idx = jnp.argsort(sqdist(x1, x1), axis=-1)[..., :nsample]
  nb = gather(x1, idx)
  direction = nb - x1[:, :, None, :]
  w = wn(direction, params["wn2"])
  gcost = gather(p2p, idx)
  out = jnp.sum(w * gcost, axis=2)                   # [B, N1, c_last]
  return jnp.transpose(out, (0, 2, 1))               # [B, c_last, N1]


if __name__ == "__main__":
  B, N1, N2, D1, D2 = 2, 16, 16, 4, 4
  nsample = 4
  mlp = [8, 8]

  key = jax.random.PRNGKey(0)
  ka, kb, kc, kd, kp = jax.random.split(key, 5)
  xyz1 = jax.random.normal(ka, (B, 3, N1), jnp.float32)
  xyz2 = jax.random.normal(kb, (B, 3, N2), jnp.float32)
  points1 = jax.random.normal(kc, (B, D1, N1), jnp.float32)
  points2 = jax.random.normal(kd, (B, D2, N2), jnp.float32)
  params = init_params(kp, D1, D2, mlp)

  out = pointconv_flow(xyz1, xyz2, points1, points2, params, nsample)
  out = jax.block_until_ready(out)

  with jax.default_matmul_precision("highest"):
    ref = reference_forward(xyz1, xyz2, points1, points2, params, nsample)
  assert out.shape == (B, mlp[-1], N1)
  err = float(jnp.max(jnp.abs(out - ref)))
  scale = float(jnp.max(jnp.abs(ref)))
  # kernel runs its gather/MLP matmuls in bf16 (accumulate f32); allow a few %
  # of the output scale against the full-f32 reference.
  assert err <= 5e-2 * max(scale, 1.0), (err, scale)
  print("KERNEL_OK")
</pallas_src>

<mosaic_0001>
module attributes {stable_mosaic.version = 11 : i64} {
  func.func @_stage1_kernel(%arg0: i32, %arg1: i32, %arg2: memref<1x16x5xf32, #tpu.memory_space<vmem>>, %arg3: memref<1x5x16xf32, #tpu.memory_space<vmem>>, %arg4: memref<1x16x16xbf16, #tpu.memory_space<vmem>>, %arg5: memref<1x16x16xf32, #tpu.memory_space<vmem>>, %arg6: memref<8x8xbf16, #tpu.memory_space<vmem>>, %arg7: memref<1x8xf32, #tpu.memory_space<vmem>>, %arg8: memref<8x8xbf16, #tpu.memory_space<vmem>>, %arg9: memref<1x8xf32, #tpu.memory_space<vmem>>, %arg10: memref<8x8xbf16, #tpu.memory_space<vmem>>, %arg11: memref<1x8xf32, #tpu.memory_space<vmem>>, %arg12: memref<1x16x8xf32, #tpu.memory_space<vmem>>) attributes {dimension_semantics = [#tpu.dimension_semantics<parallel>, #tpu.dimension_semantics<parallel>], iteration_bounds = array<i64: 2, 1>, scalar_prefetch = 0 : i64, scratch_operands = 0 : i64, tpu.core_type = #tpu.core_type<tc>, window_params = [{transform_indices = @transform_0, window_bounds = array<i64: 1, 16, 5>}, {transform_indices = @transform_1, window_bounds = array<i64: 1, 5, 16>}, {transform_indices = @transform_2, window_bounds = array<i64: 1, 16, 16>}, {transform_indices = @transform_3, window_bounds = array<i64: 1, 16, 16>}, {pipeline_mode = #tpu.pipeline_mode<synchronous>, transform_indices = @transform_4, window_bounds = array<i64: 8, 8>}, {pipeline_mode = #tpu.pipeline_mode<synchronous>, transform_indices = @transform_5, window_bounds = array<i64: 1, 8>}, {pipeline_mode = #tpu.pipeline_mode<synchronous>, transform_indices = @transform_6, window_bounds = array<i64: 8, 8>}, {pipeline_mode = #tpu.pipeline_mode<synchronous>, transform_indices = @transform_7, window_bounds = array<i64: 1, 8>}, {pipeline_mode = #tpu.pipeline_mode<synchronous>, transform_indices = @transform_8, window_bounds = array<i64: 8, 8>}, {pipeline_mode = #tpu.pipeline_mode<synchronous>, transform_indices = @transform_9, window_bounds = array<i64: 1, 8>}, {transform_indices = @transform_10, window_bounds = array<i64: 1, 16, 8>}]} {
    %c0 = arith.constant 0 : index
    %c0_0 = arith.constant 0 : index
    %c0_1 = arith.constant 0 : index
    %0 = vector.load %arg2[%c0, %c0_0, %c0_1] : memref<1x16x5xf32, #tpu.memory_space<vmem>>, vector<1x16x5xf32>
    %1 = vector.shape_cast %0 : vector<1x16x5xf32> to vector<16x5xf32>
    %c0_2 = arith.constant 0 : index
    %c0_3 = arith.constant 0 : index
    %c0_4 = arith.constant 0 : index
    %2 = vector.load %arg3[%c0_2, %c0_3, %c0_4] : memref<1x5x16xf32, #tpu.memory_space<vmem>>, vector<1x5x16xf32>
    %3 = vector.shape_cast %2 : vector<1x5x16xf32> to vector<5x16xf32>
    %c0_5 = arith.constant 0 : index
    %c0_6 = arith.constant 0 : index
    %c0_7 = arith.constant 0 : index
    %4 = vector.load %arg4[%c0_5, %c0_6, %c0_7] : memref<1x16x16xbf16, #tpu.memory_space<vmem>>, vector<1x16x16xbf16>
    %5 = vector.shape_cast %4 : vector<1x16x16xbf16> to vector<16x16xbf16>
    %c0_8 = arith.constant 0 : index
    %c0_9 = arith.constant 0 : index
    %c0_10 = arith.constant 0 : index
    %6 = vector.load %arg5[%c0_8, %c0_9, %c0_10] : memref<1x16x16xf32, #tpu.memory_space<vmem>>, vector<1x16x16xf32>
    %7 = vector.shape_cast %6 : vector<1x16x16xf32> to vector<16x16xf32>
    %c0_11 = arith.constant 0 : index
    %c0_12 = arith.constant 0 : index
    %8 = vector.load %arg6[%c0_11, %c0_12] : memref<8x8xbf16, #tpu.memory_space<vmem>>, vector<8x8xbf16>
    %c0_13 = arith.constant 0 : index
    %c0_14 = arith.constant 0 : index
    %9 = vector.load %arg7[%c0_13, %c0_14] : memref<1x8xf32, #tpu.memory_space<vmem>>, vector<1x8xf32>
    %c0_15 = arith.constant 0 : index
    %c0_16 = arith.constant 0 : index
    %10 = vector.load %arg8[%c0_15, %c0_16] : memref<8x8xbf16, #tpu.memory_space<vmem>>, vector<8x8xbf16>
    %c0_17 = arith.constant 0 : index
    %c0_18 = arith.constant 0 : index
    %11 = vector.load %arg9[%c0_17, %c0_18] : memref<1x8xf32, #tpu.memory_space<vmem>>, vector<1x8xf32>
    %c0_19 = arith.constant 0 : index
    %c0_20 = arith.constant 0 : index
    %12 = vector.load %arg10[%c0_19, %c0_20] : memref<8x8xbf16, #tpu.memory_space<vmem>>, vector<8x8xbf16>
    %c0_21 = arith.constant 0 : index
    %c0_22 = arith.constant 0 : index
    %13 = vector.load %arg11[%c0_21, %c0_22] : memref<1x8xf32, #tpu.memory_space<vmem>>, vector<1x8xf32>
    %cst = arith.constant dense<0.000000e+00> : vector<16x16xf32>
    %14 = tpu.matmul %1, %3, %cst {dimension_numbers = #tpu.dot_dimension_numbers<[1], [0], [0], [1], [0, 0, 1, 1], [], []>, precision = #tpu.contract_precision<fp32>} : vector<16x5xf32>, vector<5x16xf32>, vector<16x16xf32> -> vector<16x16xf32>
    %cst_23 = arith.constant 0.000000e+00 : f32
    %15 = vector.broadcast %cst_23 : f32 to vector<16x16xf32>
    %16 = arith.maximumf %14, %15 : vector<16x16xf32>
    %17 = tpu.iota {dimensions = array<i32: 1>} : vector<16x16xi32>
    %18 = tpu.bitcast %16 : vector<16x16xf32> -> vector<16x16xi32>
    %c-16_i32 = arith.constant -16 : i32
    %19 = vector.broadcast %c-16_i32 : i32 to vector<16x16xi32>
    %20 = arith.andi %18, %19 : vector<16x16xi32>
    %21 = arith.ori %20, %17 : vector<16x16xi32>
    %cst_24 = arith.constant 0.000000e+00 : f32
    %22 = vector.broadcast %cst_24 : f32 to vector<16x8xf32>
    %c2147483647_i32 = arith.constant 2147483647 : i32
    %c0_i32 = arith.constant 0 : i32
    %cst_25 = arith.constant dense<2147483647> : vector<16xi32>
    %23 = vector.multi_reduction <minsi>, %21, %cst_25 [1] : vector<16x16xi32> to vector<16xi32>
    %24 = vector.shape_cast %23 : vector<16xi32> to vector<16x1xi32>
    %25 = vector.broadcast %24 : vector<16x1xi32> to vector<16x16xi32>
    %26 = arith.cmpi eq, %21, %25 : vector<16x16xi32>
    %27 = vector.broadcast %c2147483647_i32 : i32 to vector<16x16xi32>
    %28 = arith.select %26, %27, %21 : vector<16x16xi1>, vector<16x16xi32>
    %cst_26 = arith.constant 1.000000e+00 : f32
    %cst_27 = arith.constant 0.000000e+00 : f32
    %29 = vector.broadcast %cst_26 : f32 to vector<16x16xf32>
    %30 = vector.broadcast %cst_27 : f32 to vector<16x16xf32>
    %31 = arith.select %26, %29, %30 : vector<16x16xi1>, vector<16x16xf32>
    %32 = arith.truncf %31 : vector<16x16xf32> to vector<16x16xbf16>
    %cst_28 = arith.constant dense<0.000000e+00> : vector<16x16xf32>
    %33 = tpu.matmul %32, %5, %cst_28 {dimension_numbers = #tpu.dot_dimension_numbers<[1], [0], [0], [1], [0, 0, 1, 1], [], []>} : vector<16x16xbf16>, vector<16x16xbf16>, vector<16x16xf32> -> vector<16x16xf32>
    %34 = arith.addf %33, %7 : vector<16x16xf32>
    %35 = vector.extract_strided_slice %34 {offsets = [0, 0], sizes = [16, 8], strides = [1, 1]} : vector<16x16xf32> to vector<16x8xf32>
    %cst_29 = arith.constant 1.000000e-01 : f32
    %36 = vector.broadcast %cst_29 : f32 to vector<16x8xf32>
    %37 = arith.mulf %36, %35 : vector<16x8xf32>
    %38 = arith.maximumf %35, %37 : vector<16x8xf32>
    %39 = vector.extract_strided_slice %34 {offsets = [0, 8], sizes = [16, 8], strides = [1, 1]} : vector<16x16xf32> to vector<16x8xf32>
    %cst_30 = arith.constant 0.000000e+00 : f32
    %40 = vector.broadcast %cst_30 : f32 to vector<16x8xf32>
    %41 = arith.maximumf %39, %40 : vector<16x8xf32>
    %42 = arith.truncf %38 : vector<16x8xf32> to vector<16x8xbf16>
    %cst_31 = arith.constant dense<0.000000e+00> : vector<16x8xf32>
    %43 = tpu.matmul %42, %8, %cst_31 {dimension_numbers = #tpu.dot_dimension_numbers<[1], [0], [0], [1], [0, 0, 1, 1], [], []>} : vector<16x8xbf16>, vector<8x8xbf16>, vector<16x8xf32> -> vector<16x8xf32>
    %44 = vector.broadcast %9 : vector<1x8xf32> to vector<16x8xf32>
    %45 = arith.addf %43, %44 : vector<16x8xf32>
    %cst_32 = arith.constant 1.000000e-01 : f32
    %46 = vector.broadcast %cst_32 : f32 to vector<16x8xf32>
    %47 = arith.mulf %46, %45 : vector<16x8xf32>
    %48 = arith.maximumf %45, %47 : vector<16x8xf32>
    %49 = arith.truncf %41 : vector<16x8xf32> to vector<16x8xbf16>
    %cst_33 = arith.constant dense<0.000000e+00> : vector<16x8xf32>
    %50 = tpu.matmul %49, %10, %cst_33 {dimension_numbers = #tpu.dot_dimension_numbers<[1], [0], [0], [1], [0, 0, 1, 1], [], []>} : vector<16x8xbf16>, vector<8x8xbf16>, vector<16x8xf32> -> vector<16x8xf32>
    %51 = vector.broadcast %11 : vector<1x8xf32> to vector<16x8xf32>
    %52 = arith.addf %50, %51 : vector<16x8xf32>
    %cst_34 = arith.constant 0.000000e+00 : f32
    %53 = vector.broadcast %cst_34 : f32 to vector<16x8xf32>
    %54 = arith.maximumf %52, %53 : vector<16x8xf32>
    %55 = arith.truncf %54 : vector<16x8xf32> to vector<16x8xbf16>
    %cst_35 = arith.constant dense<0.000000e+00> : vector<16x8xf32>
    %56 = tpu.matmul %55, %12, %cst_35 {dimension_numbers = #tpu.dot_dimension_numbers<[1], [0], [0], [1], [0, 0, 1, 1], [], []>} : vector<16x8xbf16>, vector<8x8xbf16>, vector<16x8xf32> -> vector<16x8xf32>
    %57 = vector.broadcast %13 : vector<1x8xf32> to vector<16x8xf32>
    %58 = arith.addf %56, %57 : vector<16x8xf32>
    %cst_36 = arith.constant 0.000000e+00 : f32
    %59 = vector.broadcast %cst_36 : f32 to vector<16x8xf32>
    %60 = arith.maximumf %58, %59 : vector<16x8xf32>
    %61 = arith.mulf %60, %48 : vector<16x8xf32>
    %62 = arith.addf %22, %61 : vector<16x8xf32>
    %c1_i32 = arith.constant 1 : i32
    %cst_37 = arith.constant dense<2147483647> : vector<16xi32>
    %63 = vector.multi_reduction <minsi>, %28, %cst_37 [1] : vector<16x16xi32> to vector<16xi32>
    %64 = vector.shape_cast %63 : vector<16xi32> to vector<16x1xi32>
    %65 = vector.broadcast %64 : vector<16x1xi32> to vector<16x16xi32>
    %66 = arith.cmpi eq, %28, %65 : vector<16x16xi32>
    %67 = vector.broadcast %c2147483647_i32 : i32 to vector<16x16xi32>
    %68 = arith.select %66, %67, %28 : vector<16x16xi1>, vector<16x16xi32>
    %cst_38 = arith.constant 1.000000e+00 : f32
    %cst_39 = arith.constant 0.000000e+00 : f32
    %69 = vector.broadcast %cst_38 : f32 to vector<16x16xf32>
    %70 = vector.broadcast %cst_39 : f32 to vector<16x16xf32>
    %71 = arith.select %66, %69, %70 : vector<16x16xi1>, vector<16x16xf32>
    %72 = arith.truncf %71 : vector<16x16xf32> to vector<16x16xbf16>
    %cst_40 = arith.constant dense<0.000000e+00> : vector<16x16xf32>
    %73 = tpu.matmul %72, %5, %cst_40 {dimension_numbers = #tpu.dot_dimension_numbers<[1], [0], [0], [1], [0, 0, 1, 1], [], []>} : vector<16x16xbf16>, vector<16x16xbf16>, vector<16x16xf32> -> vector<16x16xf32>
    %74 = arith.addf %73, %7 : vector<16x16xf32>
    %75 = vector.extract_strided_slice %74 {offsets = [0, 0], sizes = [16, 8], strides = [1, 1]} : vector<16x16xf32> to vector<16x8xf32>
    %cst_41 = arith.constant 1.000000e-01 : f32
    %76 = vector.broadcast %cst_41 : f32 to vector<16x8xf32>
    %77 = arith.mulf %76, %75 : vector<16x8xf32>
    %78 = arith.maximumf %75, %77 : vector<16x8xf32>
    %79 = vector.extract_strided_slice %74 {offsets = [0, 8], sizes = [16, 8], strides = [1, 1]} : vector<16x16xf32> to vector<16x8xf32>
    %cst_42 = arith.constant 0.000000e+00 : f32
    %80 = vector.broadcast %cst_42 : f32 to vector<16x8xf32>
    %81 = arith.maximumf %79, %80 : vector<16x8xf32>
    %82 = arith.truncf %78 : vector<16x8xf32> to vector<16x8xbf16>
    %cst_43 = arith.constant dense<0.000000e+00> : vector<16x8xf32>
    %83 = tpu.matmul %82, %8, %cst_43 {dimension_numbers = #tpu.dot_dimension_numbers<[1], [0], [0], [1], [0, 0, 1, 1], [], []>} : vector<16x8xbf16>, vector<8x8xbf16>, vector<16x8xf32> -> vector<16x8xf32>
    %84 = vector.broadcast %9 : vector<1x8xf32> to vector<16x8xf32>
    %85 = arith.addf %83, %84 : vector<16x8xf32>
    %cst_44 = arith.constant 1.000000e-01 : f32
    %86 = vector.broadcast %cst_44 : f32 to vector<16x8xf32>
    %87 = arith.mulf %86, %85 : vector<16x8xf32>
    %88 = arith.maximumf %85, %87 : vector<16x8xf32>
    %89 = arith.truncf %81 : vector<16x8xf32> to vector<16x8xbf16>
    %cst_45 = arith.constant dense<0.000000e+00> : vector<16x8xf32>
    %90 = tpu.matmul %89, %10, %cst_45 {dimension_numbers = #tpu.dot_dimension_numbers<[1], [0], [0], [1], [0, 0, 1, 1], [], []>} : vector<16x8xbf16>, vector<8x8xbf16>, vector<16x8xf32> -> vector<16x8xf32>
    %91 = vector.broadcast %11 : vector<1x8xf32> to vector<16x8xf32>
    %92 = arith.addf %90, %91 : vector<16x8xf32>
    %cst_46 = arith.constant 0.000000e+00 : f32
    %93 = vector.broadcast %cst_46 : f32 to vector<16x8xf32>
    %94 = arith.maximumf %92, %93 : vector<16x8xf32>
    %95 = arith.truncf %94 : vector<16x8xf32> to vector<16x8xbf16>
    %cst_47 = arith.constant dense<0.000000e+00> : vector<16x8xf32>
    %96 = tpu.matmul %95, %12, %cst_47 {dimension_numbers = #tpu.dot_dimension_numbers<[1], [0], [0], [1], [0, 0, 1, 1], [], []>} : vector<16x8xbf16>, vector<8x8xbf16>, vector<16x8xf32> -> vector<16x8xf32>
    %97 = vector.broadcast %13 : vector<1x8xf32> to vector<16x8xf32>
    %98 = arith.addf %96, %97 : vector<16x8xf32>
    %cst_48 = arith.constant 0.000000e+00 : f32
    %99 = vector.broadcast %cst_48 : f32 to vector<16x8xf32>
    %100 = arith.maximumf %98, %99 : vector<16x8xf32>
    %101 = arith.mulf %100, %88 : vector<16x8xf32>
    %102 = arith.addf %62, %101 : vector<16x8xf32>
    %c2_i32 = arith.constant 2 : i32
    %cst_49 = arith.constant dense<2147483647> : vector<16xi32>
    %103 = vector.multi_reduction <minsi>, %68, %cst_49 [1] : vector<16x16xi32> to vector<16xi32>
    %104 = vector.shape_cast %103 : vector<16xi32> to vector<16x1xi32>
    %105 = vector.broadcast %104 : vector<16x1xi32> to vector<16x16xi32>
    %106 = arith.cmpi eq, %68, %105 : vector<16x16xi32>
    %107 = vector.broadcast %c2147483647_i32 : i32 to vector<16x16xi32>
    %108 = arith.select %106, %107, %68 : vector<16x16xi1>, vector<16x16xi32>
    %cst_50 = arith.constant 1.000000e+00 : f32
    %cst_51 = arith.constant 0.000000e+00 : f32
    %109 = vector.broadcast %cst_50 : f32 to vector<16x16xf32>
    %110 = vector.broadcast %cst_51 : f32 to vector<16x16xf32>
    %111 = arith.select %106, %109, %110 : vector<16x16xi1>, vector<16x16xf32>
    %112 = arith.truncf %111 : vector<16x16xf32> to vector<16x16xbf16>
    %cst_52 = arith.constant dense<0.000000e+00> : vector<16x16xf32>
    %113 = tpu.matmul %112, %5, %cst_52 {dimension_numbers = #tpu.dot_dimension_numbers<[1], [0], [0], [1], [0, 0, 1, 1], [], []>} : vector<16x16xbf16>, vector<16x16xbf16>, vector<16x16xf32> -> vector<16x16xf32>
    %114 = arith.addf %113, %7 : vector<16x16xf32>
    %115 = vector.extract_strided_slice %114 {offsets = [0, 0], sizes = [16, 8], strides = [1, 1]} : vector<16x16xf32> to vector<16x8xf32>
    %cst_53 = arith.constant 1.000000e-01 : f32
    %116 = vector.broadcast %cst_53 : f32 to vector<16x8xf32>
    %117 = arith.mulf %116, %115 : vector<16x8xf32>
    %118 = arith.maximumf %115, %117 : vector<16x8xf32>
    %119 = vector.extract_strided_slice %114 {offsets = [0, 8], sizes = [16, 8], strides = [1, 1]} : vector<16x16xf32> to vector<16x8xf32>
    %cst_54 = arith.constant 0.000000e+00 : f32
    %120 = vector.broadcast %cst_54 : f32 to vector<16x8xf32>
    %121 = arith.maximumf %119, %120 : vector<16x8xf32>
    %122 = arith.truncf %118 : vector<16x8xf32> to vector<16x8xbf16>
    %cst_55 = arith.constant dense<0.000000e+00> : vector<16x8xf32>
    %123 = tpu.matmul %122, %8, %cst_55 {dimension_numbers = #tpu.dot_dimension_numbers<[1], [0], [0], [1], [0, 0, 1, 1], [], []>} : vector<16x8xbf16>, vector<8x8xbf16>, vector<16x8xf32> -> vector<16x8xf32>
    %124 = vector.broadcast %9 : vector<1x8xf32> to vector<16x8xf32>
    %125 = arith.addf %123, %124 : vector<16x8xf32>
    %cst_56 = arith.constant 1.000000e-01 : f32
    %126 = vector.broadcast %cst_56 : f32 to vector<16x8xf32>
    %127 = arith.mulf %126, %125 : vector<16x8xf32>
    %128 = arith.maximumf %125, %127 : vector<16x8xf32>
    %129 = arith.truncf %121 : vector<16x8xf32> to vector<16x8xbf16>
    %cst_57 = arith.constant dense<0.000000e+00> : vector<16x8xf32>
    %130 = tpu.matmul %129, %10, %cst_57 {dimension_numbers = #tpu.dot_dimension_numbers<[1], [0], [0], [1], [0, 0, 1, 1], [], []>} : vector<16x8xbf16>, vector<8x8xbf16>, vector<16x8xf32> -> vector<16x8xf32>
    %131 = vector.broadcast %11 : vector<1x8xf32> to vector<16x8xf32>
    %132 = arith.addf %130, %131 : vector<16x8xf32>
    %cst_58 = arith.constant 0.000000e+00 : f32
    %133 = vector.broadcast %cst_58 : f32 to vector<16x8xf32>
    %134 = arith.maximumf %132, %133 : vector<16x8xf32>
    %135 = arith.truncf %134 : vector<16x8xf32> to vector<16x8xbf16>
    %cst_59 = arith.constant dense<0.000000e+00> : vector<16x8xf32>
    %136 = tpu.matmul %135, %12, %cst_59 {dimension_numbers = #tpu.dot_dimension_numbers<[1], [0], [0], [1], [0, 0, 1, 1], [], []>} : vector<16x8xbf16>, vector<8x8xbf16>, vector<16x8xf32> -> vector<16x8xf32>
    %137 = vector.broadcast %13 : vector<1x8xf32> to vector<16x8xf32>
    %138 = arith.addf %136, %137 : vector<16x8xf32>
    %cst_60 = arith.constant 0.000000e+00 : f32
    %139 = vector.broadcast %cst_60 : f32 to vector<16x8xf32>
    %140 = arith.maximumf %138, %139 : vector<16x8xf32>
    %141 = arith.mulf %140, %128 : vector<16x8xf32>
    %142 = arith.addf %102, %141 : vector<16x8xf32>
    %c3_i32 = arith.constant 3 : i32
    %cst_61 = arith.constant dense<2147483647> : vector<16xi32>
    %143 = vector.multi_reduction <minsi>, %108, %cst_61 [1] : vector<16x16xi32> to vector<16xi32>
    %144 = vector.shape_cast %143 : vector<16xi32> to vector<16x1xi32>
    %145 = vector.broadcast %144 : vector<16x1xi32> to vector<16x16xi32>
    %146 = arith.cmpi eq, %108, %145 : vector<16x16xi32>
    %147 = vector.broadcast %c2147483647_i32 : i32 to vector<16x16xi32>
    %148 = arith.select %146, %147, %108 : vector<16x16xi1>, vector<16x16xi32>
    %cst_62 = arith.constant 1.000000e+00 : f32
    %cst_63 = arith.constant 0.000000e+00 : f32
    %149 = vector.broadcast %cst_62 : f32 to vector<16x16xf32>
    %150 = vector.broadcast %cst_63 : f32 to vector<16x16xf32>
    %151 = arith.select %146, %149, %150 : vector<16x16xi1>, vector<16x16xf32>
    %152 = arith.truncf %151 : vector<16x16xf32> to vector<16x16xbf16>
    %cst_64 = arith.constant dense<0.000000e+00> : vector<16x16xf32>
    %153 = tpu.matmul %152, %5, %cst_64 {dimension_numbers = #tpu.dot_dimension_numbers<[1], [0], [0], [1], [0, 0, 1, 1], [], []>} : vector<16x16xbf16>, vector<16x16xbf16>, vector<16x16xf32> -> vector<16x16xf32>
    %154 = arith.addf %153, %7 : vector<16x16xf32>
    %155 = vector.extract_strided_slice %154 {offsets = [0, 0], sizes = [16, 8], strides = [1, 1]} : vector<16x16xf32> to vector<16x8xf32>
    %cst_65 = arith.constant 1.000000e-01 : f32
    %156 = vector.broadcast %cst_65 : f32 to vector<16x8xf32>
    %157 = arith.mulf %156, %155 : vector<16x8xf32>
    %158 = arith.maximumf %155, %157 : vector<16x8xf32>
    %159 = vector.extract_strided_slice %154 {offsets = [0, 8], sizes = [16, 8], strides = [1, 1]} : vector<16x16xf32> to vector<16x8xf32>
    %cst_66 = arith.constant 0.000000e+00 : f32
    %160 = vector.broadcast %cst_66 : f32 to vector<16x8xf32>
    %161 = arith.maximumf %159, %160 : vector<16x8xf32>
    %162 = arith.truncf %158 : vector<16x8xf32> to vector<16x8xbf16>
    %cst_67 = arith.constant dense<0.000000e+00> : vector<16x8xf32>
    %163 = tpu.matmul %162, %8, %cst_67 {dimension_numbers = #tpu.dot_dimension_numbers<[1], [0], [0], [1], [0, 0, 1, 1], [], []>} : vector<16x8xbf16>, vector<8x8xbf16>, vector<16x8xf32> -> vector<16x8xf32>
    %164 = vector.broadcast %9 : vector<1x8xf32> to vector<16x8xf32>
    %165 = arith.addf %163, %164 : vector<16x8xf32>
    %cst_68 = arith.constant 1.000000e-01 : f32
    %166 = vector.broadcast %cst_68 : f32 to vector<16x8xf32>
    %167 = arith.mulf %166, %165 : vector<16x8xf32>
    %168 = arith.maximumf %165, %167 : vector<16x8xf32>
    %169 = arith.truncf %161 : vector<16x8xf32> to vector<16x8xbf16>
    %cst_69 = arith.constant dense<0.000000e+00> : vector<16x8xf32>
    %170 = tpu.matmul %169, %10, %cst_69 {dimension_numbers = #tpu.dot_dimension_numbers<[1], [0], [0], [1], [0, 0, 1, 1], [], []>} : vector<16x8xbf16>, vector<8x8xbf16>, vector<16x8xf32> -> vector<16x8xf32>
    %171 = vector.broadcast %11 : vector<1x8xf32> to vector<16x8xf32>
    %172 = arith.addf %170, %171 : vector<16x8xf32>
    %cst_70 = arith.constant 0.000000e+00 : f32
    %173 = vector.broadcast %cst_70 : f32 to vector<16x8xf32>
    %174 = arith.maximumf %172, %173 : vector<16x8xf32>
    %175 = arith.truncf %174 : vector<16x8xf32> to vector<16x8xbf16>
    %cst_71 = arith.constant dense<0.000000e+00> : vector<16x8xf32>
    %176 = tpu.matmul %175, %12, %cst_71 {dimension_numbers = #tpu.dot_dimension_numbers<[1], [0], [0], [1], [0, 0, 1, 1], [], []>} : vector<16x8xbf16>, vector<8x8xbf16>, vector<16x8xf32> -> vector<16x8xf32>
    %177 = vector.broadcast %13 : vector<1x8xf32> to vector<16x8xf32>
    %178 = arith.addf %176, %177 : vector<16x8xf32>
    %cst_72 = arith.constant 0.000000e+00 : f32
    %179 = vector.broadcast %cst_72 : f32 to vector<16x8xf32>
    %180 = arith.maximumf %178, %179 : vector<16x8xf32>
    %181 = arith.mulf %180, %168 : vector<16x8xf32>
    %182 = arith.addf %142, %181 : vector<16x8xf32>
    %c0_73 = arith.constant 0 : index
    %c0_74 = arith.constant 0 : index
    %c0_75 = arith.constant 0 : index
    %183 = vector.load %arg12[%c0_73, %c0_74, %c0_75] : memref<1x16x8xf32, #tpu.memory_space<vmem>>, vector<1x16x8xf32>
    %184 = vector.shape_cast %183 : vector<1x16x8xf32> to vector<16x8xf32>
    %185 = vector.shape_cast %182 : vector<16x8xf32> to vector<1x16x8xf32>
    tpu.vector_store %arg12[%c0_73, %c0_74, %c0_75], %185 {strides = array<i32>} : memref<1x16x8xf32, #tpu.memory_space<vmem>>, vector<1x16x8xf32>,
    return
  }
  func.func @transform_0(%arg0: i32, %arg1: i32) -> (i32, i32, i32) {
    %c0_i32 = arith.constant 0 : i32
    %c0_i32_0 = arith.constant 0 : i32
    return %arg0, %arg1, %c0_i32 : i32, i32, i32
  }
  func.func @transform_1(%arg0: i32, %arg1: i32) -> (i32, i32, i32) {
    %c0_i32 = arith.constant 0 : i32
    %c0_i32_0 = arith.constant 0 : i32
    %c0_i32_1 = arith.constant 0 : i32
    return %arg0, %c0_i32, %c0_i32_0 : i32, i32, i32
  }
  func.func @transform_2(%arg0: i32, %arg1: i32) -> (i32, i32, i32) {
    %c0_i32 = arith.constant 0 : i32
    %c0_i32_0 = arith.constant 0 : i32
    %c0_i32_1 = arith.constant 0 : i32
    return %arg0, %c0_i32, %c0_i32_0 : i32, i32, i32
  }
  func.func @transform_3(%arg0: i32, %arg1: i32) -> (i32, i32, i32) {
    %c0_i32 = arith.constant 0 : i32
    %c0_i32_0 = arith.constant 0 : i32
    return %arg0, %arg1, %c0_i32 : i32, i32, i32
  }
  func.func @transform_4(%arg0: i32, %arg1: i32) -> (i32, i32) {
    %c0_i32 = arith.constant 0 : i32
    %c0_i32_0 = arith.constant 0 : i32
    %c0_i32_1 = arith.constant 0 : i32
    return %c0_i32, %c0_i32_0 : i32, i32
  }
  func.func @transform_5(%arg0: i32, %arg1: i32) -> (i32, i32) {
    %c0_i32 = arith.constant 0 : i32
    %c0_i32_0 = arith.constant 0 : i32
    %c0_i32_1 = arith.constant 0 : i32
    return %c0_i32, %c0_i32_0 : i32, i32
  }
  func.func @transform_6(%arg0: i32, %arg1: i32) -> (i32, i32) {
    %c0_i32 = arith.constant 0 : i32
    %c0_i32_0 = arith.constant 0 : i32
    %c0_i32_1 = arith.constant 0 : i32
    return %c0_i32, %c0_i32_0 : i32, i32
  }
  func.func @transform_7(%arg0: i32, %arg1: i32) -> (i32, i32) {
    %c0_i32 = arith.constant 0 : i32
    %c0_i32_0 = arith.constant 0 : i32
    %c0_i32_1 = arith.constant 0 : i32
    return %c0_i32, %c0_i32_0 : i32, i32
  }
  func.func @transform_8(%arg0: i32, %arg1: i32) -> (i32, i32) {
    %c0_i32 = arith.constant 0 : i32
    %c0_i32_0 = arith.constant 0 : i32
    %c0_i32_1 = arith.constant 0 : i32
    return %c0_i32, %c0_i32_0 : i32, i32
  }
  func.func @transform_9(%arg0: i32, %arg1: i32) -> (i32, i32) {
    %c0_i32 = arith.constant 0 : i32
    %c0_i32_0 = arith.constant 0 : i32
    %c0_i32_1 = arith.constant 0 : i32
    return %c0_i32, %c0_i32_0 : i32, i32
  }
  func.func @transform_10(%arg0: i32, %arg1: i32) -> (i32, i32, i32) {
    %c0_i32 = arith.constant 0 : i32
    %c0_i32_0 = arith.constant 0 : i32
    return %arg0, %arg1, %c0_i32 : i32, i32, i32
  }
}

</mosaic_0001>

<bundles_post_ra>
// kernel: tpu_custom_call.1
= control target key start
LH: loop header
LB: loop body
LE: loop exit
PB: predicated region body
PF: predicated region fallthrough
CT: control target
= control target key end

     0   :  { %s2445_s13 = smov 0   ;;  %s2447_s14 = smov 0   ;;  %s2725_s0 = inlined_call_operand.vmem [shape: f32[2,16,5], index: 0, kind: input, shape index: {}]   ;;  %s2726_s1 = inlined_call_operand.vmem [shape: f32[2,5,16], index: 1, kind: input, shape index: {}]   ;;  %s2727_s2 = inlined_call_operand.vmem [shape: bf16[2,16,16], index: 2, kind: input, shape index: {}]   ;;  %s2728_s3 = inlined_call_operand.vmem [shape: f32[2,16,16], index: 3, kind: input, shape index: {}]   ;;  %s2729_s4 = inlined_call_operand.vmem [shape: bf16[8,8], index: 4, kind: input, shape index: {}]   ;;  %s2730_s5 = inlined_call_operand.vmem [shape: f32[1,8], index: 5, kind: input, shape index: {}]   ;;  %s2731_s6 = inlined_call_operand.vmem [shape: bf16[8,8], index: 6, kind: input, shape index: {}]   ;;  %s2732_s7 = inlined_call_operand.vmem [shape: f32[1,8], index: 7, kind: input, shape index: {}]   ;;  %s2733_s8 = inlined_call_operand.vmem [shape: bf16[8,8], index: 8, kind: input, shape index: {}]   ;;  %s2734_s9 = inlined_call_operand.vmem [shape: f32[1,8], index: 9, kind: input, shape index: {}]   ;;  %s2735_s10 = inlined_call_operand.vmem [shape: f32[2,16,8], index: 10, kind: output, shape index: {}]  }
   0x1   :  { %s2449_s15 = smov 0  }
   0x2 LB: > { %s32_s16 = sadd.s32 1, %s2381_s14  ;;  %p2113_p0 = scmp.ge.s32.totalorder %s2385_s15, 1  ;;  %s2385_s15 = sphi %s2449_s15, %s20_s15   ;;  %s2381_s14 = sphi %s2447_s14, %s2737_s14   ;;  %s2377_s13 = sphi %s2445_s13, %s2736_s13  }
   0x3   : > { %p34_p1 = scmp.ge.s32.totalorder %s32_s16, 2  ;;  %p369_p2 = scmp.lt.s32.totalorder %s2385_s15, 3 }
   0x5   : > { %s2739_s16 = smov (%p34_p1, %s32_s16), 0  ;;  %p370_p3 = pnand %p2113_p0, %p369_p2 }
   0x6   : > { %p434_p4 = scmp.lt.s32.totalorder (!%p370_p3), %s2377_s13, 1  ;;  %vm493_vm0 = vcmask (!%p370_p3), 1044480   ;;  %vm486_vm1 = vcmask (!%p370_p3), 39936   ;;  %v988_v23 = vlaneseq (!%p370_p3)  ;;  %vm996_vm2 = vcmask (!%p370_p3), 130048   ;;  %s2389_s19 = smov (!%p370_p3), 120  }
   0x7   : > { %373 = sbr.rel (%p370_p3) target bundleno = 2394 (0x95a), region = 60  ;;  %v2387_v41 = vmov (!%p370_p3), 0.0   ;;  %vm2388_vm5 = vmmov (!%p370_p3), 0   ;;  %vm1101_vm8 = vcmask (!%p370_p3), 1043456   ;;  %vm1097_vm11 = vcmask (!%p370_p3), 64512  }
   0x8   : > { %v989_v29 = vand.u32 (!%p370_p3), 127, %v988_v23 }
   0xe   : > { %s2741_s13 = smov (!%p434_p4, %s2377_s13), 1 }
   0xf   : > { %s2116_s17 = sshll.u32 %s2741_s13, 3  ;;  %s2467_s18 = sshll.u32 %s2741_s13, 4 }
  0x10   : > { %s446_s21 = scalar_lea.vmem %s2726_s1, %s2116_s17  ;;  %s441_s24 = scalar_lea.vmem %s2725_s0, %s2467_s18 }
  0x11   : > { %v475_v0 = vld [vmem:[%s446_s21] sm:$0x1f]  ;;  %v474_v2 = vld [vmem:[%s441_s24 + $0x8] sm:$0xff]  ;;  %s451_s27 = scalar_lea.vmem %s2727_s2, %s2116_s17  ;;  %s460_s12 = scalar_lea.vmem %s2728_s3, %s2467_s18 }
  0x12   : > { %v473_v1 = vld [vmem:[%s441_s24] sm:$0xff]  ;;  %v495_v3 = vsel %vm493_vm0, %v475_v0, 0  ;;  %v491_v5 = vsel %vm486_vm1, %v474_v2, 0  ;;  %s470_s30 = scalar_lea.vmem %s2735_s10, %s2467_s18 }
  0x13   : > { %v488_v4 = vsel %vm486_vm1, %v473_v1, 0  ;;  %v498_v6 = vand.u32 4294901760, %v495_v3  ;;  %v573_v8 = vand.u32 4294901760, %v491_v5  ;;  %v2487_v50 = vld [vmem:[%s451_s27] sm:$0xff]  }
  0x14   : > { %v563_v7 = vand.u32 4294901760, %v488_v4 }
  0x15   : > { %v585_v9 = vsub.f32 %v495_v3, %v498_v6  ;;  %v574_v11 = vsub.f32 %v491_v5, %v573_v8  ;;  %2199 = vmatprep.subr.mxu1 %v498_v6 }
  0x16   : > { %2206 = vmatprep.mubr.f32.mxu0 %v563_v7  ;;  %v564_v10 = vsub.f32 %v488_v4, %v563_v7  ;;  %2200 = vmatpush3.msra.mxu1 %v498_v6 }
  0x17   : > { %v586_v12 = vand.u32 4294901760, %v585_v9  ;;  %v575_v14 = vand.u32 4294901760, %v574_v11  ;;  %2229 = vmatprep.subr.bf16.mxu1 %v2387_v41 }
  0x18   : > { %v565_v13 = vand.u32 4294901760, %v564_v10 }
  0x19   : > { %v587_v15 = vsub.f32 %v585_v9, %v586_v12  ;;  %v576_v17 = vsub.f32 %v574_v11, %v575_v14 }
  0x1a   : > { %v566_v16 = vsub.f32 %v564_v10, %v565_v13 }
  0x1b   : > { %v588_v18 = vand.u32 4294901760, %v587_v15  ;;  %v577_v20 = vand.u32 4294901760, %v576_v17 }
  0x1c   : > { %v567_v19 = vand.u32 4294901760, %v566_v16 }
  0x1d   : > { %2204 = vmatprep.subr.mxu0 %v588_v18 }
  0x1e   : > { %2201 = vmatprep.mubr.f32.mxu1 %v567_v19  ;;  %2205 = vmatpush3.msra.mxu0 %v588_v18  ;;  %v2520_v18 = vld [vmem:[%s460_s12] sm:$0xff] }
  0x1f   : > { %2202 = vmatmul.mubr.f32.vlgmr.msra.gmra.mrb[0].mxu1 %v577_v20  ;;  %2207 = vmatmul.mubr.f32.vlgmr.msra.gmra.mrb[0].mxu0 %v573_v8  ;;  %v2522_v20 = vld [vmem:[%s460_s12 + $0x8] sm:$0xff] }
  0x20   : > { %2209 = vmatprep.subr.mxu0 %v585_v9  ;;  %2211 = vmatprep.mubr.f32.mxu0 %v564_v10 }
  0x21   : > { %2210 = vmatpush3.msra.mxu0 %v585_v9  ;;  %2230 = vmatpush3.bf16.msra.mxu1 %v2487_v50 }
  0x22   : > { %2214 = vmatprep.subr.mxu0 %v498_v6  ;;  %2235 = vmatprep.subr.bf16.mxu1 %v2387_v41 }
  0x23   : > { %2231 = vmatprep.mubr.msk.bf16.mxu1 %vm2388_vm5, %v2387_v41 }
  0x27   : > { %2212 = vmatmul.mubr.f32.vlgmr.msra.gmra.mrb[0].mxu0 %v574_v11 }
  0x28   : > { %2215 = vmatpush3.msra.mxu0 %v498_v6  ;;  %2216 = vmatprep.mubr.f32.mxu0 %v565_v13 }
  0x29   : > { %2219 = vmatprep.subr.mxu0 %v586_v12 }
  0x2f   : > { %2217 = vmatmul.mubr.f32.vlgmr.msra.gmra.mrb[0].mxu0 %v575_v14 }
  0x30   : > { %2220 = vmatpush3.msra.mxu0 %v586_v12  ;;  %2221 = vmatprep.mubr.f32.mxu0 %v563_v7 }
  0x31   : > { %2224 = vmatprep.subr.mxu0 %v498_v6 }
  0x37   : > { %2222 = vmatmul.mubr.f32.vlgmr.msra.gmra.mrb[0].mxu0 %v573_v8 }
  0x38   : > { %2225 = vmatpush3.msra.mxu0 %v498_v6  ;;  %2226 = vmatprep.mubr.f32.mxu0 %v563_v7 }
  0x39   : > { %2247 = vmatprep.subr.bf16.mxu0 %v2387_v41 }
  0x3f   : > { %2227 = vmatmul.mubr.f32.vlgmr.msra.gmra.mrb[0].mxu0 %v573_v8  ;;  %v480_v8 = vld [vmem:[%s2729_s4] sm:$0xf] }
  0x40   : > { %2249 = vmatprep.mubr.msk.bf16.mxu0 %vm2388_vm5, %v2387_v41  ;;  %v2512_v9 = vsel %vm1101_vm8, %v480_v8, 0 }
  0xf2   : > { %v2203_v21 = vpop.f32.mrb[0].mxu1 }
  0xf3   : > { %v569_v22 = vpop.f32.mrb[1].mxu1 }
 0x112   : > { %v2228_v24 = vpop.f32.mrb[0].mxu0 }
 0x113   : > { %v2325_v25 = vadd.f32 %v2228_v24, %v2203_v21  ;;  %v976_v26 = vpop.f32.mrb[1].mxu0 }
 0x114   : > { %v2326_v27 = vadd.f32 %v976_v26, %v569_v22 }
 0x115   : > { %v987_v28 = vmax.f32 %v2325_v25, 0.0 }
 0x116   : > { %v986_v30 = vmax.f32 %v2326_v27, 0.0 }
 0x117   : > { %v993_v31 = vand.u32 4294967280, %v987_v28 }
 0x118   : > { %v992_v32 = vand.u32 4294967280, %v986_v30  ;;  %v482_v30 = vld [vmem:[%s2731_s6] sm:$0xf] }
 0x119   : > { %v995_v33 = vor.u32 %v993_v31, %v989_v29 }
 0x11a   : > { %v994_v34 = vor.u32 %v992_v32, %v989_v29 }
 0x11b   : > { %v1012_v36 = vsel %vm996_vm2, %v995_v33, 2147483647 }
 0x11c   : > { %v997_v35 = vsel %vm996_vm2, %v994_v34, 2147483647  ;;  %v1014_v39 = vshra.s32 %v1012_v36, 16  ;;  %v1013_v45 = vand.u32 65535, %v1012_v36 }
 0x11d   : > { %v999_v37 = vshra.s32 %v997_v35, 16  ;;  %v998_v42 = vand.u32 65535, %v997_v35  ;;  %v2531_v35 = vsel %vm1101_vm8, %v482_v30, 0 }
 0x11e   : > { %v1016_v40 = vcvt.s32.f32 %v1014_v39  ;;  %v1015_v48 = vcvt.s32.f32 %v1013_v45 }
 0x11f   : > { %v1001_v38 = vcvt.s32.f32 %v999_v37  ;;  %v1000_v44 = vcvt.s32.f32 %v998_v42 }
 0x121   : > { %1002 = vmin.xlane.f32.xlu0 %v1001_v38 }
 0x125   : > { %1017 = vmin.xlane.f32.xlu0 %v1016_v40 }
 0x1ae   : > { %v1003_v43 = vpop.xlane.xlu0 %1002 }
 0x1af   : > { %vm1004_vm3 = vcmp.eq.f32.partialorder %v1001_v38, %v1003_v43  ;;  %v1009_v51 = vcvt.f32.s32 %v1003_v43 }
 0x1b0   : > { %v1005_v46 = vsel %vm1004_vm3, %v1000_v44, inf }
 0x1b1   : > { %1006 = vmin.xlane.f32.xlu1 %v1005_v46  ;;  %v1010_v53 = vshll.u32 %v1009_v51, 16 }
 0x1b2   : > { %v1018_v47 = vpop.xlane.xlu0 %1017 }
 0x1b3   : > { %vm1019_vm4 = vcmp.eq.f32.partialorder %v1016_v40, %v1018_v47  ;;  %v1024_v54 = vcvt.f32.s32 %v1018_v47 }
 0x1b4   : > { %v1020_v49 = vsel %vm1019_vm4, %v1015_v48, inf }
 0x1b5   : > { %1021 = vmin.xlane.f32.xlu1 %v1020_v49  ;;  %v1025_v58 = vshll.u32 %v1024_v54, 16 }
 0x23e   : > { %v1007_v52 = vpop.xlane.xlu1 %1006 }
 0x23f   : > { %v1008_v55 = vcvt.f32.s32 %v1007_v52 }
 0x241   : > { %v1011_v56 = vadd.s32 %v1010_v53, %v1008_v55 }
 0x242   : > { %v1022_v57 = vpop.xlane.xlu1 %1021 }
 0x243   : > { %vm1027_vm6 = vcmp.eq.s32.totalorder %v994_v34, %v1011_v56  ;;  %v1023_v59 = vcvt.f32.s32 %v1022_v57 }
 0x244   : > { %v2495_v60 = vsel %vm1027_vm6, 2147483647, %v994_v34  ;;  %v1031_v0 = vsel %vm1027_vm6, 1.0, %v2387_v41 }
 0x245   : > { %v1026_v61 = vadd.s32 %v1025_v58, %v1023_v59  ;;  %v1269_v62 = vsel %vm996_vm2, %v2495_v60, 2147483647 }
 0x246   : > { %v1271_v63 = vshra.s32 %v1269_v62, 16  ;;  %v1270_v10 = vand.u32 65535, %v1269_v62 }
 0x247   : > { %vm1028_vm7 = vcmp.eq.s32.totalorder %v995_v33, %v1026_v61  ;;  %v484_v61 = vld [vmem:[%s2733_s8] sm:$0xf] }
 0x248   : > { %v1032_v1 = vsel %vm1028_vm7, 1.0, %v2387_v41  ;;  %v1273_v2 = vcvt.s32.f32 %v1271_v63  ;;  %v2501_v3 = vsel %vm1028_vm7, 2147483647, %v995_v33  ;;  %v1272_v12 = vcvt.s32.f32 %v1270_v10 }
 0x249   : > { %v1033_v4 = vpack.c.bf16 %v1032_v1, %v1031_v0  ;;  %v1284_v5 = vsel %vm996_vm2, %v2501_v3, 2147483647  ;;  %v2570_v62 = vsel %vm1101_vm8, %v484_v61, 0 }
 0x24a   : > { %1274 = vmin.xlane.f32.xlu0 %v1273_v2  ;;  %v1286_v6 = vshra.s32 %v1284_v5, 16  ;;  %v1285_v13 = vand.u32 65535, %v1284_v5  ;;  %2248 = vmatpush3.bf16.msra.mxu0 %v2570_v62 }
 0x24b   : > { %2232 = vmatmul.mubr.msk.bf16.vlgmr.msra.gmra.mrb[4].mxu1 %vm996_vm2, %v1033_v4  ;;  %2259 = vmatprep.subr.bf16.mxu0 %v2387_v41 }
 0x24c   : > { %v1288_v7 = vcvt.s32.f32 %v1286_v6  ;;  %2237 = vmatprep.mubr.msk.bf16.mxu1 %vm2388_vm5, %v2387_v41  ;;  %2236 = vmatpush3.bf16.msra.mxu1 %v2512_v9  ;;  %v1287_v16 = vcvt.s32.f32 %v1285_v13 }
 0x24d   : > { %2241 = vmatprep.subr.bf16.mxu1 %v2387_v41 }
 0x24e   : > { %1289 = vmin.xlane.f32.xlu1 %v1288_v7 }
 0x2d7   : > { %v1275_v11 = vpop.xlane.xlu0 %1274 }
 0x2d8   : > { %vm1276_vm9 = vcmp.eq.f32.partialorder %v1273_v2, %v1275_v11  ;;  %v1281_v36 = vcvt.f32.s32 %v1275_v11  ;;  %v2581_v11 = vld [vmem:[%s2732_s7] ss:$0 sm:$0xff] }
 0x2d9   : > { %v1277_v14 = vsel %vm1276_vm9, %v1272_v12, inf }
 0x2da   : > { %1278 = vmin.xlane.f32.xlu0 %v1277_v14  ;;  %v1282_v38 = vshll.u32 %v1281_v36, 16 }
 0x2db   : > { %v1290_v15 = vpop.xlane.xlu1 %1289 }
 0x2dc   : > { %vm1291_vm10 = vcmp.eq.f32.partialorder %v1288_v7, %v1290_v15  ;;  %v1296_v39 = vcvt.f32.s32 %v1290_v15 }
 0x2dd   : > { %v1292_v17 = vsel %vm1291_vm10, %v1287_v16, inf }
 0x2de   : > { %1293 = vmin.xlane.f32.xlu1 %v1292_v17  ;;  %v1297_v44 = vshll.u32 %v1296_v39, 16 }
 0x31e   : > { %v1077_v19 = vpop.f32.mrb[4].mxu1 }
 0x31f   : > { %v1078_v21 = vadd.f32 %v1077_v19, %v2520_v18  ;;  %v2233_v22 = vpop.f32.mrb[5].mxu1 }
 0x320   : > { %v1080_v23 = vpop.f32.mrb[6].mxu1 }
 0x321   : > { %v1084_v24 = vmul.f32 0.1, %v1078_v21  ;;  %v1081_v25 = vadd.f32 %v1080_v23, %v2522_v20  ;;  %v2234_v26 = vpop.f32.mrb[7].mxu1  ;;  %v1088_v27 = vmax.f32 %v1078_v21, 0.0 }
 0x323   : > { %v1085_v28 = vmul.f32 0.1, %v1081_v25  ;;  %v1089_v29 = vmax.f32 %v1081_v25, 0.0  ;;  %v1086_v31 = vmax.f32 %v1078_v21, %v1084_v24 }
 0x325   : > { %v1087_v32 = vmax.f32 %v1081_v25, %v1085_v28  ;;  %v1150_v33 = vpack.c.bf16 %v1089_v29, %v1088_v27 }
 0x327   : > { %v1090_v34 = vpack.c.bf16 %v1087_v32, %v1086_v31  ;;  %1158 = vrot.lane.b32.xlu0 %v1150_v33, %s2389_s19 }
 0x329   : > { %2238 = vmatmul.mubr.msk.bf16.vlgmr.msra.gmra.mrb[8].mxu1 %vm1097_vm11, %v1090_v34 }
 0x32a   : > { %2242 = vmatpush3.bf16.msra.mxu1 %v2531_v35  ;;  %2243 = vmatprep.mubr.msk.bf16.mxu1 %vm2388_vm5, %v2387_v41 }
 0x32b   : > { %2253 = vmatprep.subr.bf16.mxu1 %v2387_v41 }
 0x367   : > { %v1279_v37 = vpop.xlane.xlu0 %1278 }
 0x368   : > { %v1280_v40 = vcvt.f32.s32 %v1279_v37 }
 0x36a   : > { %v1283_v42 = vadd.s32 %v1282_v38, %v1280_v40 }
 0x36b   : > { %v1294_v43 = vpop.xlane.xlu1 %1293 }
 0x36c   : > { %vm1299_vm12 = vcmp.eq.s32.totalorder %v2495_v60, %v1283_v42  ;;  %v1295_v45 = vcvt.f32.s32 %v1294_v43 }
 0x36d   : > { %v2542_v46 = vsel %vm1299_vm12, 2147483647, %v2495_v60  ;;  %v1303_v58 = vsel %vm1299_vm12, 1.0, %v2387_v41 }
 0x36e   : > { %v1298_v47 = vadd.s32 %v1297_v44, %v1295_v45  ;;  %v1506_v48 = vsel %vm996_vm2, %v2542_v46, 2147483647 }
 0x36f   : > { %v1508_v49 = vshra.s32 %v1506_v48, 16  ;;  %v1507_v6 = vand.u32 65535, %v1506_v48 }
 0x370   : > { %vm1300_vm13 = vcmp.eq.s32.totalorder %v2501_v3, %v1298_v47 }
 0x371   : > { %v1510_v51 = vcvt.s32.f32 %v1508_v49  ;;  %v2548_v52 = vsel %vm1300_vm13, 2147483647, %v2501_v3  ;;  %v1304_v57 = vsel %vm1300_vm13, 1.0, %v2387_v41  ;;  %v1509_v8 = vcvt.s32.f32 %v1507_v6 }
 0x372   : > { %v1521_v53 = vsel %vm996_vm2, %v2548_v52, 2147483647  ;;  %v1305_v59 = vpack.c.bf16 %v1304_v57, %v1303_v58 }
 0x373   : > { %1511 = vmin.xlane.f32.xlu1 %v1510_v51  ;;  %v1523_v54 = vshra.s32 %v1521_v53, 16  ;;  %v1522_v3 = vand.u32 65535, %v1521_v53 }
 0x375   : > { %v1525_v55 = vcvt.s32.f32 %v1523_v54  ;;  %v1524_v5 = vcvt.s32.f32 %v1522_v3 }
 0x377   : > { %1526 = vmin.xlane.f32.xlu1 %v1525_v55 }
 0x399   : > { %v1159_v56 = vpop.permute.xlu0 %1158 }
 0x39a   : > { %2244 = vmatmul.mubr.msk.bf16.vlgmr.msra.gmra.mrb[12].mxu1 %vm1097_vm11, %v1159_v56 }
 0x39b   : > { %2254 = vmatpush3.bf16.msra.mxu1 %v2487_v50  ;;  %2255 = vmatprep.mubr.msk.bf16.mxu1 %vm2388_vm5, %v2387_v41 }
 0x39c   : > { %2265 = vmatprep.subr.bf16.mxu1 %v2387_v41 }
 0x3a2   : > { %2256 = vmatmul.mubr.msk.bf16.vlgmr.msra.gmra.mrb[16].mxu1 %vm996_vm2, %v1305_v59 }
 0x3a3   : > { %2266 = vmatpush3.bf16.msra.mxu1 %v2531_v35  ;;  %2267 = vmatprep.mubr.msk.bf16.mxu1 %vm2388_vm5, %v2387_v41 }
 0x3a4   : > { %2277 = vmatprep.subr.bf16.mxu1 %v2387_v41 }
 0x3fc   : > { %v2574_v60 = vpop.f32.mrb[8].mxu1 }
 0x3fd   : > { %v2239_v63 = vpop.f32.mrb[9].mxu1 }
 0x3fe   : > { %v2576_v0 = vpop.f32.mrb[10].mxu1 }
 0x3ff   : > { %v2240_v1 = vpop.f32.mrb[11].mxu1 }
 0x400   : > { %v1512_v2 = vpop.xlane.xlu1 %1511 }
 0x401   : > { %vm1513_vm15 = vcmp.eq.f32.partialorder %v1510_v51, %v1512_v2  ;;  %v1518_v40 = vcvt.f32.s32 %v1512_v2 }
 0x402   : > { %v1514_v10 = vsel %vm1513_vm15, %v1509_v8, inf }
 0x403   : > { %v1519_v47 = vshll.u32 %v1518_v40, 16 }
 0x404   : > { %v1527_v4 = vpop.xlane.xlu1 %1526 }
 0x405   : > { %vm1528_vm14 = vcmp.eq.f32.partialorder %v1525_v55, %v1527_v4  ;;  %v1533_v38 = vcvt.f32.s32 %v1527_v4 }
 0x406   : > { %v1529_v7 = vsel %vm1528_vm14, %v1524_v5, inf }
 0x407   : > { %1530 = vmin.xlane.f32.xlu1 %v1529_v7  ;;  %v1534_v42 = vshll.u32 %v1533_v38, 16 }
 0x40b   : > { %1515 = vmin.xlane.f32.xlu1 %v1514_v10  ;;  %v2631_v10 = vld [vmem:[%s2730_s5] ss:$0 sm:$0xff] }
 0x46d   : > { %v1200_v12 = vpop.f32.mrb[12].mxu1 }
 0x46e   : > { %v1201_v13 = vadd.f32 %v2581_v11, %v1200_v12  ;;  %v2245_v14 = vpop.f32.mrb[13].mxu1  ;;  %v1140_v12 = vadd.f32 %v2631_v10, %v2574_v60 }
 0x46f   : > { %v1203_v15 = vpop.f32.mrb[14].mxu1  ;;  %v2640_v14 = vld [vmem:[%s2734_s9] ss:$0 sm:$0xff] }
 0x470   : > { %v1204_v16 = vadd.f32 %v2581_v11, %v1203_v15  ;;  %v2246_v17 = vpop.f32.mrb[15].mxu1  ;;  %v1207_v19 = vmax.f32 %v1201_v13, 0.0  ;;  %v1143_v13 = vadd.f32 %v2631_v10, %v2576_v0  ;;  %v1146_v15 = vmul.f32 0.1, %v1140_v12 }
 0x472   : > { %v1208_v21 = vmax.f32 %v1204_v16, 0.0  ;;  %v1147_v17 = vmul.f32 0.1, %v1143_v13 }
 0x474   : > { %v1209_v22 = vpack.c.bf16 %v1208_v21, %v1207_v19 }
 0x475   : > { %v1343_v23 = vpop.f32.mrb[16].mxu1 }
 0x476   : > { %v1344_v24 = vadd.f32 %v1343_v23, %v2520_v18  ;;  %2250 = vmatmul.mubr.msk.bf16.vlgmr.msra.gmra.mrb[4].mxu0 %vm1097_vm11, %v1209_v22  ;;  %v2257_v25 = vpop.f32.mrb[17].mxu1  ;;  %v1148_v23 = vmax.f32 %v1140_v12, %v1146_v15 }
 0x477   : > { %v1346_v26 = vpop.f32.mrb[18].mxu1  ;;  %2260 = vmatpush3.bf16.msra.mxu0 %v2512_v9  ;;  %2261 = vmatprep.mubr.msk.bf16.mxu0 %vm2388_vm5, %v2387_v41 }
 0x478   : > { %v1350_v27 = vmul.f32 0.1, %v1344_v24  ;;  %v1347_v28 = vadd.f32 %v1346_v26, %v2522_v20  ;;  %v2258_v29 = vpop.f32.mrb[19].mxu1  ;;  %2271 = vmatprep.subr.bf16.mxu0 %v2387_v41  ;;  %v1354_v30 = vmax.f32 %v1344_v24, 0.0  ;;  %v1149_v26 = vmax.f32 %v1143_v13, %v1147_v17 }
 0x47a   : > { %v1351_v31 = vmul.f32 0.1, %v1347_v28  ;;  %v1355_v32 = vmax.f32 %v1347_v28, 0.0  ;;  %v1352_v33 = vmax.f32 %v1344_v24, %v1350_v27 }
 0x47c   : > { %v1353_v34 = vmax.f32 %v1347_v28, %v1351_v31  ;;  %v1405_v36 = vpack.c.bf16 %v1355_v32, %v1354_v30 }
 0x47e   : > { %v1356_v37 = vpack.c.bf16 %v1353_v34, %v1352_v33  ;;  %1407 = vrot.lane.b32.xlu1 %v1405_v36, %s2389_s19 }
 0x480   : > { %2262 = vmatmul.mubr.msk.bf16.vlgmr.msra.gmra.mrb[8].mxu0 %vm1097_vm11, %v1356_v37 }
 0x481   : > { %2272 = vmatpush3.bf16.msra.mxu0 %v2570_v62  ;;  %2273 = vmatprep.mubr.msk.bf16.mxu0 %vm2388_vm5, %v2387_v41 }
 0x482   : > { %2283 = vmatprep.subr.bf16.mxu0 %v2387_v41 }
 0x494   : > { %v1531_v39 = vpop.xlane.xlu1 %1530 }
 0x495   : > { %v1532_v43 = vcvt.f32.s32 %v1531_v39 }
 0x497   : > { %v1535_v44 = vadd.s32 %v1534_v42, %v1532_v43 }
 0x498   : > { %v1516_v45 = vpop.xlane.xlu1 %1515 }
 0x499   : > { %vm1537_vm0 = vcmp.eq.s32.totalorder %v2548_v52, %v1535_v44  ;;  %v1517_v48 = vcvt.f32.s32 %v1516_v45 }
 0x49a   : > { %v2600_v49 = vsel %vm1537_vm0, 2147483647, %v2548_v52  ;;  %v1541_v55 = vsel %vm1537_vm0, 1.0, %v2387_v41 }
 0x49b   : > { %v1520_v51 = vadd.s32 %v1519_v47, %v1517_v48  ;;  %v1758_v53 = vsel %vm996_vm2, %v2600_v49, 2147483647 }
 0x49c   : > { %v1760_v54 = vshra.s32 %v1758_v53, 16 }
 0x49d   : > { %vm1536_vm1 = vcmp.eq.s32.totalorder %v2542_v46, %v1520_v51 }
 0x49e   : > { %v1540_v56 = vsel %vm1536_vm1, 1.0, %v2387_v41  ;;  %v2608_v57 = vsel %vm1536_vm1, 2147483647, %v2542_v46  ;;  %v1762_v52 = vcvt.s32.f32 %v1760_v54  ;;  %v1759_v46 = vand.u32 65535, %v1758_v53 }
 0x49f   : > { %v1542_v58 = vpack.c.bf16 %v1541_v55, %v1540_v56  ;;  %v1743_v59 = vsel %vm996_vm2, %v2608_v57, 2147483647 }
 0x4a0   : > { %v1745_v61 = vshra.s32 %v1743_v59, 16  ;;  %v1761_v3 = vcvt.s32.f32 %v1759_v46  ;;  %v1744_v4 = vand.u32 65535, %v1743_v59 }
 0x4a2   : > { %1763 = vmin.xlane.f32.xlu1 %v1762_v52  ;;  %v1747_v63 = vcvt.s32.f32 %v1745_v61  ;;  %v1746_v7 = vcvt.s32.f32 %v1744_v4 }
 0x4a4   : > { %1748 = vmin.xlane.f32.xlu0 %v1747_v63 }
 0x4f0   : > { %v1408_v1 = vpop.permute.xlu1 %1407 }
 0x4f1   : > { %2268 = vmatmul.mubr.msk.bf16.vlgmr.msra.gmra.mrb[20].mxu1 %vm1097_vm11, %v1408_v1 }
 0x4f2   : > { %2278 = vmatpush3.bf16.msra.mxu1 %v2487_v50  ;;  %2279 = vmatprep.mubr.msk.bf16.mxu1 %vm2388_vm5, %v2387_v41 }
 0x4f3   : > { %2289 = vmatprep.subr.bf16.mxu1 %v2387_v41 }
 0x4f9   : > { %2280 = vmatmul.mubr.msk.bf16.vlgmr.msra.gmra.mrb[24].mxu1 %vm996_vm2, %v1542_v58 }
 0x4fa   : > { %2290 = vmatpush3.bf16.msra.mxu1 %v2531_v35  ;;  %2291 = vmatprep.mubr.msk.bf16.mxu1 %vm2388_vm5, %v2387_v41 }
 0x4fb   : > { %2301 = vmatprep.subr.bf16.mxu1 %v2387_v41 }
 0x52f   : > { %v2622_v2 = vpop.xlane.xlu1 %1763 }
 0x530   : > { %vm1765_vm3 = vcmp.eq.f32.partialorder %v1762_v52, %v2622_v2  ;;  %v1770_v4 = vcvt.f32.s32 %v2622_v2 }
 0x531   : > { %v2625_v5 = vpop.xlane.xlu0 %1748  ;;  %v1766_v6 = vsel %vm1765_vm3, %v1761_v3, inf }
 0x532   : > { %1767 = vmin.xlane.f32.xlu0 %v1766_v6  ;;  %vm1750_vm4 = vcmp.eq.f32.partialorder %v1747_v63, %v2625_v5  ;;  %v1755_v3 = vcvt.f32.s32 %v2625_v5  ;;  %v1771_v12 = vshll.u32 %v1770_v4, 16 }
 0x533   : > { %v1751_v8 = vsel %vm1750_vm4, %v1746_v7, inf }
 0x534   : > { %v1756_v7 = vshll.u32 %v1755_v3, 16 }
 0x536   : > { %1752 = vmin.xlane.f32.xlu0 %v1751_v8 }
 0x549   : > { %v1256_v16 = vpop.f32.mrb[4].mxu0 }
 0x54a   : > { %v1257_v19 = vadd.f32 %v2640_v14, %v1256_v16  ;;  %v2251_v21 = vpop.f32.mrb[5].mxu0 }
 0x54b   : > { %v1259_v22 = vpop.f32.mrb[6].mxu0 }
 0x54c   : > { %v1263_v24 = vmax.f32 %v1257_v19, 0.0  ;;  %v1260_v25 = vadd.f32 %v2640_v14, %v1259_v22  ;;  %v2252_v60 = vpop.f32.mrb[7].mxu0 }
 0x54e   : > { %v2644_v27 = vmul.f32 %v1263_v24, %v1148_v23  ;;  %v1264_v0 = vmax.f32 %v1260_v25, 0.0 }
 0x550   : > { %v2646_v28 = vmul.f32 %v1264_v0, %v1149_v26 }
 0x553   : > { %v1394_v29 = vpop.f32.mrb[8].mxu0 }
 0x554   : > { %v2263_v30 = vpop.f32.mrb[9].mxu0 }
 0x555   : > { %v1397_v31 = vpop.f32.mrb[10].mxu0 }
 0x556   : > { %v2264_v32 = vpop.f32.mrb[11].mxu0 }
 0x5bf   : > { %v1768_v1 = vpop.xlane.xlu0 %1767 }
 0x5c0   : > { %v1769_v8 = vcvt.f32.s32 %v1768_v1 }
 0x5c2   : > { %v1772_v15 = vadd.s32 %v1771_v12, %v1769_v8 }
 0x5c3   : > { %v1753_v46 = vpop.xlane.xlu0 %1752 }
 0x5c4   : > { %v1446_v33 = vpop.f32.mrb[20].mxu1  ;;  %v1754_v6 = vcvt.f32.s32 %v1753_v46  ;;  %vm1774_vm7 = vcmp.eq.s32.totalorder %v2600_v49, %v1772_v15 }
 0x5c5   : > { %v1447_v34 = vadd.f32 %v2581_v11, %v1446_v33  ;;  %v2269_v36 = vpop.f32.mrb[21].mxu1  ;;  %v1776_v5 = vsel %vm1774_vm7, 1.0, %v2387_v41 }
 0x5c6   : > { %v1449_v37 = vpop.f32.mrb[22].mxu1  ;;  %v1757_v13 = vadd.s32 %v1756_v7, %v1754_v6 }
 0x5c7   : > { %v1450_v38 = vadd.f32 %v2581_v11, %v1449_v37  ;;  %v2270_v39 = vpop.f32.mrb[23].mxu1  ;;  %v1453_v40 = vmax.f32 %v1447_v34, 0.0 }
 0x5c8   : > { %vm1773_vm6 = vcmp.eq.s32.totalorder %v2608_v57, %v1757_v13  ;;  %v1398_v57 = vadd.f32 %v2631_v10, %v1397_v31 }
 0x5c9   : > { %v1454_v42 = vmax.f32 %v1450_v38, 0.0  ;;  %v1775_v2 = vsel %vm1773_vm6, 1.0, %v2387_v41 }
 0x5ca   : > { %v1777_v17 = vpack.c.bf16 %v1776_v5, %v1775_v2  ;;  %v1402_v21 = vmul.f32 0.1, %v1398_v57 }
 0x5cb   : > { %v1455_v43 = vpack.c.bf16 %v1454_v42, %v1453_v40 }
 0x5cc   : > { %v1580_v44 = vpop.f32.mrb[24].mxu1 }
 0x5cd   : > { %v1581_v45 = vadd.f32 %v1580_v44, %v2520_v18  ;;  %2274 = vmatmul.mubr.msk.bf16.vlgmr.msra.gmra.mrb[12].mxu0 %vm1097_vm11, %v1455_v43  ;;  %v2281_v47 = vpop.f32.mrb[25].mxu1 }
 0x5ce   : > { %v1583_v48 = vpop.f32.mrb[26].mxu1  ;;  %2284 = vmatpush3.bf16.msra.mxu0 %v2512_v9  ;;  %2285 = vmatprep.mubr.msk.bf16.mxu0 %vm2388_vm5, %v2387_v41 }
 0x5cf   : > { %v1587_v51 = vmul.f32 0.1, %v1581_v45  ;;  %v1584_v53 = vadd.f32 %v1583_v48, %v2522_v20  ;;  %v2282_v54 = vpop.f32.mrb[27].mxu1  ;;  %2295 = vmatprep.subr.bf16.mxu0 %v2387_v41  ;;  %v1591_v55 = vmax.f32 %v1581_v45, 0.0 }
 0x5d1   : > { %v1588_v56 = vmul.f32 0.1, %v1584_v53  ;;  %v1592_v58 = vmax.f32 %v1584_v53, 0.0  ;;  %v1589_v59 = vmax.f32 %v1581_v45, %v1587_v51 }
 0x5d3   : > { %v1590_v52 = vmax.f32 %v1584_v53, %v1588_v56  ;;  %v1642_v61 = vpack.c.bf16 %v1592_v58, %v1591_v55 }
 0x5d5   : > { %v1593_v63 = vpack.c.bf16 %v1590_v52, %v1589_v59  ;;  %1644 = vrot.lane.b32.xlu0 %v1642_v61, %s2389_s19 }
 0x5d7   : > { %2286 = vmatmul.mubr.msk.bf16.vlgmr.msra.gmra.mrb[16].mxu0 %vm1097_vm11, %v1593_v63 }
 0x5d8   : > { %2296 = vmatpush3.bf16.msra.mxu0 %v2570_v62  ;;  %2297 = vmatprep.mubr.msk.bf16.mxu0 %vm2388_vm5, %v2387_v41 }
 0x5d9   : > { %2307 = vmatprep.subr.bf16.mxu0 %v2387_v41 }
 0x647   : > { %v1645_v16 = vpop.permute.xlu0 %1644 }
 0x648   : > { %2292 = vmatmul.mubr.msk.bf16.vlgmr.msra.gmra.mrb[28].mxu1 %vm1097_vm11, %v1645_v16 }
 0x649   : > { %2302 = vmatpush3.bf16.msra.mxu1 %v2487_v50  ;;  %2303 = vmatprep.mubr.msk.bf16.mxu1 %vm2388_vm5, %v2387_v41  ;;  %v1395_v50 = vadd.f32 %v2631_v10, %v1394_v29 }
 0x64a   : > { %2313 = vmatprep.subr.bf16.mxu1 %v2387_v41 }
 0x64b   : > { %v1401_v19 = vmul.f32 0.1, %v1395_v50 }
 0x64d   : > { %v1403_v25 = vmax.f32 %v1395_v50, %v1401_v19 }
 0x650   : > { %2304 = vmatmul.mubr.msk.bf16.vlgmr.msra.gmra.mrb[32].mxu1 %vm996_vm2, %v1777_v17 }
 0x651   : > { %2314 = vmatpush3.bf16.msra.mxu1 %v2531_v35  ;;  %2315 = vmatprep.mubr.msk.bf16.mxu1 %vm2388_vm5, %v2387_v41  ;;  %v1404_v35 = vmax.f32 %v1398_v57, %v1402_v21 }
 0x6a0   : > { %v1493_v49 = vpop.f32.mrb[12].mxu0 }
 0x6a1   : > { %v1494_v22 = vadd.f32 %v2640_v14, %v1493_v49  ;;  %v2275_v23 = vpop.f32.mrb[13].mxu0 }
 0x6a2   : > { %v1496_v24 = vpop.f32.mrb[14].mxu0 }
 0x6a3   : > { %v1500_v60 = vmax.f32 %v1494_v22, 0.0  ;;  %v1497_v26 = vadd.f32 %v2640_v14, %v1496_v24  ;;  %v2276_v0 = vpop.f32.mrb[15].mxu0 }
 0x6a5   : > { %v1502_v30 = vmul.f32 %v1500_v60, %v1403_v25  ;;  %v1501_v32 = vmax.f32 %v1497_v26, 0.0 }
 0x6a7   : > { %v1504_v33 = vadd.f32 %v1502_v30, %v2644_v27  ;;  %v1503_v29 = vmul.f32 %v1501_v32, %v1404_v35 }
 0x6a9   : > { %v1505_v31 = vadd.f32 %v1503_v29, %v2646_v28 }
 0x6aa   : > { %v1631_v34 = vpop.f32.mrb[16].mxu0 }
 0x6ab   : > { %v2287_v36 = vpop.f32.mrb[17].mxu0 }
 0x6ac   : > { %v1634_v37 = vpop.f32.mrb[18].mxu0 }
 0x6ad   : > { %v2288_v38 = vpop.f32.mrb[19].mxu0  ;;  %v1635_v3 = vadd.f32 %v2631_v10, %v1634_v37 }
 0x6af   : > { %v1639_v7 = vmul.f32 0.1, %v1635_v3 }
 0x71b   : > { %v1683_v39 = vpop.f32.mrb[28].mxu1 }
 0x71c   : > { %v1684_v40 = vadd.f32 %v2581_v11, %v1683_v39  ;;  %v2293_v42 = vpop.f32.mrb[29].mxu1 }
 0x71d   : > { %v1686_v43 = vpop.f32.mrb[30].mxu1 }
 0x71e   : > { %v1687_v44 = vadd.f32 %v2581_v11, %v1686_v43  ;;  %v2294_v45 = vpop.f32.mrb[31].mxu1  ;;  %v1690_v47 = vmax.f32 %v1684_v40, 0.0 }
 0x720   : > { %v1691_v48 = vmax.f32 %v1687_v44, 0.0 }
 0x722   : > { %v1692_v51 = vpack.c.bf16 %v1691_v48, %v1690_v47 }
 0x723   : > { %v1815_v53 = vpop.f32.mrb[32].mxu1 }
 0x724   : > { %v1816_v27 = vadd.f32 %v1815_v53, %v2520_v18  ;;  %2298 = vmatmul.mubr.msk.bf16.vlgmr.msra.gmra.mrb[20].mxu0 %vm1097_vm11, %v1692_v51  ;;  %v2305_v28 = vpop.f32.mrb[33].mxu1 }
 0x725   : > { %v1818_v54 = vpop.f32.mrb[34].mxu1  ;;  %2308 = vmatpush3.bf16.msra.mxu0 %v2512_v9  ;;  %2309 = vmatprep.mubr.msk.bf16.mxu0 %vm2388_vm5, %v2387_v41 }
 0x726   : > { %v1822_v55 = vmul.f32 0.1, %v1816_v27  ;;  %v1819_v56 = vadd.f32 %v1818_v54, %v2522_v20  ;;  %v2306_v58 = vpop.f32.mrb[35].mxu1  ;;  %2319 = vmatprep.subr.bf16.mxu0 %v2387_v41  ;;  %v1826_v59 = vmax.f32 %v1816_v27, 0.0  ;;  %v1632_v20 = vadd.f32 %v2631_v10, %v1631_v34 }
 0x728   : > { %v1823_v52 = vmul.f32 0.1, %v1819_v56  ;;  %v1827_v61 = vmax.f32 %v1819_v56, 0.0  ;;  %v1824_v63 = vmax.f32 %v1816_v27, %v1822_v55  ;;  %v1638_v4 = vmul.f32 0.1, %v1632_v20 }
 0x72a   : > { %v1825_v18 = vmax.f32 %v1819_v56, %v1823_v52  ;;  %v1877_v1 = vpack.c.bf16 %v1827_v61, %v1826_v59  ;;  %v1640_v15 = vmax.f32 %v1632_v20, %v1638_v4 }
 0x72c   : > { %v1828_v46 = vpack.c.bf16 %v1825_v18, %v1824_v63  ;;  %1879 = vrot.lane.b32.xlu1 %v1877_v1, %s2389_s19 }
 0x72e   : > { %2310 = vmatmul.mubr.msk.bf16.vlgmr.msra.gmra.mrb[24].mxu0 %vm1097_vm11, %v1828_v46 }
 0x72f   : > { %2320 = vmatpush3.bf16.msra.mxu0 %v2570_v62  ;;  %2321 = vmatprep.mubr.msk.bf16.mxu0 %vm2388_vm5, %v2387_v41  ;;  %v1641_v41 = vmax.f32 %v1635_v3, %v1639_v7 }
 0x79e   : > { %v1880_v9 = vpop.permute.xlu1 %1879 }
 0x79f   : > { %2316 = vmatmul.mubr.msk.bf16.vlgmr.msra.gmra.mrb[36].mxu1 %vm1097_vm11, %v1880_v9 }
 0x7f7   : > { %v1730_v6 = vpop.f32.mrb[20].mxu0 }
 0x7f8   : > { %v1731_v8 = vadd.f32 %v2640_v14, %v1730_v6  ;;  %v2299_v12 = vpop.f32.mrb[21].mxu0 }
 0x7f9   : > { %v1733_v13 = vpop.f32.mrb[22].mxu0 }
 0x7fa   : > { %v1737_v16 = vmax.f32 %v1731_v8, 0.0  ;;  %v1734_v62 = vadd.f32 %v2640_v14, %v1733_v13  ;;  %v2300_v2 = vpop.f32.mrb[23].mxu0 }
 0x7fc   : > { %v1739_v5 = vmul.f32 %v1737_v16, %v1640_v15  ;;  %v1738_v17 = vmax.f32 %v1734_v62, 0.0 }
 0x7fe   : > { %v1741_v50 = vadd.f32 %v1739_v5, %v1504_v33  ;;  %v1740_v57 = vmul.f32 %v1738_v17, %v1641_v41 }
 0x800   : > { %v1742_v19 = vadd.f32 %v1740_v57, %v1505_v31 }
 0x801   : > { %v1866_v49 = vpop.f32.mrb[24].mxu0 }
 0x802   : > { %v2311_v21 = vpop.f32.mrb[25].mxu0  ;;  %v1867_v33 = vadd.f32 %v2631_v10, %v1866_v49 }
 0x803   : > { %v1869_v22 = vpop.f32.mrb[26].mxu0 }
 0x804   : > { %v2312_v23 = vpop.f32.mrb[27].mxu0  ;;  %v1870_v31 = vadd.f32 %v2631_v10, %v1869_v22  ;;  %v1873_v34 = vmul.f32 0.1, %v1867_v33 }
 0x806   : > { %v1874_v37 = vmul.f32 0.1, %v1870_v31  ;;  %v1875_v42 = vmax.f32 %v1867_v33, %v1873_v34 }
 0x808   : > { %v1876_v45 = vmax.f32 %v1870_v31, %v1874_v37 }
 0x872   : > { %v1918_v24 = vpop.f32.mrb[36].mxu1 }
 0x873   : > { %v1919_v25 = vadd.f32 %v2581_v11, %v1918_v24  ;;  %v2317_v60 = vpop.f32.mrb[37].mxu1 }
 0x874   : > { %v1921_v26 = vpop.f32.mrb[38].mxu1 }
 0x875   : > { %v1922_v0 = vadd.f32 %v2581_v11, %v1921_v26  ;;  %v2318_v35 = vpop.f32.mrb[39].mxu1  ;;  %v1925_v30 = vmax.f32 %v1919_v25, 0.0 }
 0x877   : > { %v1926_v32 = vmax.f32 %v1922_v0, 0.0 }
 0x879   : > { %v1927_v29 = vpack.c.bf16 %v1926_v32, %v1925_v30 }
 0x87b   : > { %2322 = vmatmul.mubr.msk.bf16.vlgmr.msra.gmra.mrb[28].mxu0 %vm1097_vm11, %v1927_v29 }
 0x94e   : > { %v1965_v36 = vpop.f32.mrb[28].mxu0 }
 0x94f   : > { %v1966_v38 = vadd.f32 %v2640_v14, %v1965_v36  ;;  %v2323_v39 = vpop.f32.mrb[29].mxu0 }
 0x950   : > { %v1968_v40 = vpop.f32.mrb[30].mxu0 }
 0x951   : > { %v1972_v11 = vmax.f32 %v1966_v38, 0.0  ;;  %v1969_v43 = vadd.f32 %v2640_v14, %v1968_v40  ;;  %v2324_v44 = vpop.f32.mrb[31].mxu0 }
 0x953   : > { %v1974_v47 = vmul.f32 %v1972_v11, %v1875_v42  ;;  %v1973_v48 = vmax.f32 %v1969_v43, 0.0 }
 0x955   : > { %v1976_v10 = vadd.f32 %v1974_v47, %v1741_v50  ;;  %v1975_v51 = vmul.f32 %v1973_v48, %v1876_v45 }
 0x957   : > { %1978 = vst.msk [vmem:[%s470_s30] sm:$0xff] %vm1097_vm11, %v1976_v10  ;;  %v1977_v53 = vadd.f32 %v1975_v51, %v1742_v19 }
 0x959   : > { %1979 = vst.msk [vmem:[%s470_s30 + $0x8] sm:$0xff] %vm1097_vm11, %v1977_v53 }
 0x95a PF: > { %s20_s15 = sadd.s32 1, %s2385_s15   ;;  %s2736_s13 = smov %s2381_s14 }
 0x95b   : > { %p17_p5 = scmp.ge.s32.totalorder %s20_s15, 4   ;;  %s2737_s14 = smov %s2739_s16 }
 0x95d   :  { %19 = sbr.rel (!%p17_p5) target bundleno = 2 (0x2), region = 99 }

</bundles_post_ra>
